<compile_context>
chip_gen: v7x
topology: tpu7x:2x2x1
jax: 0.10.0
libtpu: 0.0.40
codegen_flags: <defaults>
</compile_context>

<pallas_src>
import functools
import math

import jax
import jax.numpy as jnp
from jax.experimental import pallas as pl
from jax.experimental.pallas import tpu as pltpu


NEG = -1.0e30   # finite sentinel; Python float -> inlined literal, not captured
BIG = 1.0e30    # "no members in this group" LSE -> exp(logit - BIG) == 0


def _round_up(x, m):
    return ((x + m - 1) // m) * m


def _cdiv(a, b):
    return -(-a // b)


def _logits_from_slab(slab_ref, pool, *, S, V):
    """Per-head logits, transposed layout (H, tm): heads on sublanes, edges on lanes.

    slab_ref: (C, tm) packed feature slab ref (rows = features, lanes = edges)
    pool:     (H, S+V) head-pooling matrix with 1/sqrt(S), 1/sqrt(V) folded in.
    """
    qv_r = 2 * S
    kv_r = 2 * S + 3 * V
    qo_r = 2 * S + 6 * V
    ko_r = qo_r + 9

    qs = slab_ref[0:S, :]
    ks = slab_ref[S:2 * S, :]
    scal = qs * ks                                                   # (S, tm)

    # Rotate vector features into the local frame (v_local[:,v,k] = sum_j v[:,v,j]*O[:,j,k])
    # and accumulate the per-channel dot product over the spatial axis k.
    vec = None
    for k in range(3):
        q_loc = None
        k_loc = None
        for j in range(3):
            qv_j = slab_ref[qv_r + V * j: qv_r + V * (j + 1), :]        # (V, tm)
            kv_j = slab_ref[kv_r + V * j: kv_r + V * (j + 1), :]
            qo_jk = slab_ref[qo_r + 3 * j + k: qo_r + 3 * j + k + 1, :]  # (1, tm)
            ko_jk = slab_ref[ko_r + 3 * j + k: ko_r + 3 * j + k + 1, :]
            # TODO(synk): switch to stride-0 sublane-broadcast loads
            # (slab_ref[pl.ds(row, V, stride=0), :]) once validated on the
            # target toolchain; modest VALU / vreg-pressure win.
            tq = qv_j * qo_jk
            tk = kv_j * ko_jk
            q_loc = tq if q_loc is None else q_loc + tq
            k_loc = tk if k_loc is None else k_loc + tk
        term = q_loc * k_loc
        vec = term if vec is None else vec + term                        # (V, tm)

    prod = jnp.concatenate([scal, vec], axis=0)                          # (S+V, tm)
    # Single fused pooling matmul; result already heads-on-sublanes / edges-on-lanes.
    return jnp.dot(pool, prod, preferred_element_type=jnp.float32)       # (H, tm)


def _gvp_stats_kernel(slab_ref, idx_ref, pool_ref,
                      logits_ref, gmax_ref, gsum_ref, *, S, V, G):
    """Pass 1: emit logits (lane-dense) + online per-(head, group) max / exp-sum."""
    @pl.when(pl.program_id(1) == 0)
    def _init():
        gmax_ref[...] = jnp.full(gmax_ref.shape, NEG, gmax_ref.dtype)
        gsum_ref[...] = jnp.zeros(gsum_ref.shape, gsum_ref.dtype)

    logits = _logits_from_slab(slab_ref, pool_ref[...], S=S, V=V)        # (H, tm)
    logits_ref[...] = logits

    tm = logits.shape[1]
    idx = idx_ref[...]                                                   # (1, tm) int32
    gid = jax.lax.broadcasted_iota(jnp.int32, (G, tm), 0)
    onehot = (gid == idx).astype(jnp.float32)                            # (G, tm)

    # Per-head shift (one lane-reduce), exp only on (H, tm), group sums via
    # one MXU matmul (contraction over lanes).  Invalid / padding lanes have
    # an all-zero one-hot column and contribute nothing.
    head_max = jnp.max(logits, axis=-1, keepdims=True)                   # (H, 1)
    p = jnp.exp(logits - head_max)                                       # (H, tm)
    tile_sum = jax.lax.dot_general(
        p, onehot, (((1,), (1,)), ((), ())),
        preferred_element_type=jnp.float32)                              # (H, G)

    # Flash-style merge with the resident (H, G) running statistics.
    old_max = gmax_ref[...]
    old_sum = gsum_ref[...]
    new_max = jnp.maximum(old_max, head_max)                             # (H, G)
    gsum_ref[...] = (old_sum * jnp.exp(old_max - new_max)
                     + tile_sum * jnp.exp(head_max - new_max))
    gmax_ref[...] = new_max


def _gvp_norm_kernel(logits_ref, idx_ref, glse_ref, out_ref, *, G):
    """Pass 2: gather fused group LSE with one one-hot matmul, normalize."""
    logits = logits_ref[...]                                             # (H, tm)
    idx = idx_ref[...]                                                   # (1, tm)
    tm = logits.shape[1]
    gid = jax.lax.broadcasted_iota(jnp.int32, (G, tm), 0)
    onehot = (gid == idx).astype(jnp.float32)                            # (G, tm)

    row_lse = jnp.dot(glse_ref[...], onehot,
                      preferred_element_type=jnp.float32)                # (H, tm)
    valid = (idx >= 0) & (idx < G)                                       # (1, tm)
    attn = jnp.exp(logits - row_lse)
    out_ref[...] = jnp.where(valid, attn, 0.0)                           # (H, tm)


def gvp_attention(query_x, query_vector_x, query_orientations,
                  key_x, key_vector_x, key_orientations,
                  softmax_index, *, num_heads, num_groups, max_tile_m=2048):
    M, S = query_x.shape
    V = query_vector_x.shape[1]
    H = num_heads
    G = num_groups
    assert S % H == 0 and V % H == 0
    assert key_x.shape == query_x.shape
    assert key_vector_x.shape == query_vector_x.shape
    f32 = jnp.float32

    # --- slab row layout -----------------------------------------------------
    C0 = 2 * S + 6 * V + 18
    C = _round_up(C0, 8)

    # --- tile sizing: minimal padding + VMEM-budgeted tiles --------------------
    # Double-buffered per-lane-column footprint in pass 1: slab (2C) + logits
    # out (2H) + idx (2) words.  24 MiB is safe across v5e/v6e/v7x with the
    # 32 MiB scoped-VMEM limit requested below.
    VMEM_BUDGET = 24 * 1024 * 1024
    per_col = 4 * (2 * C + 2 * H + 2)
    tm_cap = max(128, (VMEM_BUDGET // per_col) // 128 * 128)
    max_tile_m = max(128, min(max_tile_m, tm_cap))

    # Leading grid axis of size 2 marked "parallel": shards pass 1 across both
    # TensorCores on v7x; on v5e/v6e it is just an outer loop of 2.
    NC = 1 if M <= 128 else 2
    n_tiles = _round_up(max(1, _cdiv(M, max_tile_m)), NC)
    tm = _round_up(_cdiv(M, n_tiles), 128)
    Mpad = n_tiles * tm
    n_inner = n_tiles // NC

    # --- packed, transposed, lane-dense slab: (C, Mpad) ------------------------
    # TODO(synk): ideally upstream producers emit this feature-major layout
    # directly; the transposes/pad below are one extra HBM pass.
    qv_t = jnp.transpose(query_vector_x.astype(f32), (2, 1, 0)).reshape(3 * V, M)
    kv_t = jnp.transpose(key_vector_x.astype(f32), (2, 1, 0)).reshape(3 * V, M)
    qo_t = query_orientations.astype(f32).reshape(M, 9).T
    ko_t = key_orientations.astype(f32).reshape(M, 9).T
    slab = jnp.concatenate(
        [query_x.astype(f32).T, key_x.astype(f32).T, qv_t, kv_t, qo_t, ko_t],
        axis=0)                                                          # (C0, M)
    slab = jnp.pad(slab, ((0, C - C0), (0, Mpad - M)))
    # softmax_index stays int32, padding lanes get -1 (invalid -> output 0).
    idx = jnp.pad(softmax_index.astype(jnp.int32)[None, :],
                  ((0, 0), (0, Mpad - M)), constant_values=-1)           # (1, Mpad)

    # --- fused head-pooling matrix with 1/sqrt scales folded in ---------------
    heads = jnp.arange(H, dtype=jnp.int32)[:, None]
    s_head = (jnp.arange(S, dtype=jnp.int32) // (S // H))[None, :]
    v_head = (jnp.arange(V, dtype=jnp.int32) // (V // H))[None, :]
    pool = jnp.concatenate(
        [(heads == s_head).astype(f32) * (1.0 / math.sqrt(S)),
         (heads == v_head).astype(f32) * (1.0 / math.sqrt(V))],
        axis=1)                                                          # (H, S+V)

    cparams1 = pltpu.CompilerParams(
        dimension_semantics=("parallel", "arbitrary"),
        vmem_limit_bytes=32 * 1024 * 1024)
    cparams2 = pltpu.CompilerParams(
        dimension_semantics=("parallel",),
        vmem_limit_bytes=32 * 1024 * 1024)

    # --- pass 1: logits + per-core flash stats --------------------------------
    stats_kernel = functools.partial(_gvp_stats_kernel, S=S, V=V, G=G)
    logits_t, gmax, gsum = pl.pallas_call(
        stats_kernel,
        out_shape=(jax.ShapeDtypeStruct((H, Mpad), f32),
                   jax.ShapeDtypeStruct((NC, H, G), f32),
                   jax.ShapeDtypeStruct((NC, H, G), f32)),
        grid=(NC, n_inner),
        in_specs=[
            pl.BlockSpec((C, tm), lambda c, i: (0, c * n_inner + i)),
            pl.BlockSpec((1, tm), lambda c, i: (0, c * n_inner + i)),
            pl.BlockSpec((H, S + V), lambda c, i: (0, 0)),
        ],
        out_specs=(
            pl.BlockSpec((H, tm), lambda c, i: (0, c * n_inner + i)),
            pl.BlockSpec((None, H, G), lambda c, i: (c, 0, 0)),
            pl.BlockSpec((None, H, G), lambda c, i: (c, 0, 0)),
        ),
        compiler_params=cparams1,
    )(slab, idx, pool)

    # --- merge per-core stats + fuse into glse = gmax + log(gsum) (tiny) ------
    m = jnp.max(gmax, axis=0)                                            # (H, G)
    ssum = jnp.sum(gsum * jnp.exp(gmax - m[None]), axis=0)               # (H, G)
    glse = jnp.where(ssum > 0.0,
                     m + jnp.log(jnp.maximum(ssum, 1e-37)),
                     BIG)                                                # (H, G)

    # --- pass 2: normalize; reads only (H+1) lane-dense rows per edge ---------
    norm_kernel = functools.partial(_gvp_norm_kernel, G=G)
    attn_t = pl.pallas_call(
        norm_kernel,
        out_shape=jax.ShapeDtypeStruct((H, Mpad), f32),
        grid=(n_tiles,),
        in_specs=[
            pl.BlockSpec((H, tm), lambda i: (0, i)),
            pl.BlockSpec((1, tm), lambda i: (0, i)),
            pl.BlockSpec((H, G), lambda i: (0, 0)),
        ],
        out_specs=pl.BlockSpec((H, tm), lambda i: (0, i)),
        compiler_params=cparams2,
    )(logits_t, idx, glse)

    return attn_t[:, :M].T                                               # (M, H)


def _reference(query_x, query_vector_x, query_orientations,
               key_x, key_vector_x, key_orientations,
               softmax_index, num_heads, num_groups):
    M, Sq = query_x.shape
    Vq = query_vector_x.shape[1]
    H = num_heads
    qv_loc = jnp.einsum("mvj,mjk->mvk", query_vector_x, query_orientations)
    kv_loc = jnp.einsum("mvj,mjk->mvk", key_vector_x, key_orientations)
    qs_h = query_x.reshape(M, H, Sq // H)
    ks_h = key_x.reshape(M, H, Sq // H)
    qv_h = qv_loc.reshape(M, H, Vq // H, 3)
    kv_h = kv_loc.reshape(M, H, Vq // H, 3)
    logits = ((qs_h * ks_h).sum(-1) / jnp.sqrt(jnp.float32(Sq))
              + (qv_h * kv_h).sum((-1, -2)) / jnp.sqrt(jnp.float32(Vq)))
    out = jnp.zeros_like(logits)
    for g in range(num_groups):
        mask = (softmax_index == g)[:, None]
        gl = jnp.where(mask, logits, -jnp.inf)
        sm = jax.nn.softmax(gl, axis=0)
        out = jnp.where(mask, sm, out)
    return out


if __name__ == "__main__":
    # Small, module-consistent shapes: M edges, H heads, 8 scalar / 4 vector channels.
    M, H = 300, 2
    S_CH, V_CH = 8, 4
    NUM_GROUPS = 5

    key = jax.random.PRNGKey(0)
    k1, k2, k3, k4, k5, k6, k7 = jax.random.split(key, 7)

    query_x = jax.random.normal(k1, (M, S_CH), dtype=jnp.float32)
    key_x = jax.random.normal(k2, (M, S_CH), dtype=jnp.float32)
    query_vector_x = jax.random.normal(k3, (M, V_CH, 3), dtype=jnp.float32)
    key_vector_x = jax.random.normal(k4, (M, V_CH, 3), dtype=jnp.float32)

    # Orthonormal orientation matrices (one per node) via QR.
    q_raw = jax.random.normal(k5, (M, 3, 3), dtype=jnp.float32)
    k_raw = jax.random.normal(k6, (M, 3, 3), dtype=jnp.float32)
    query_orientations, _ = jnp.linalg.qr(q_raw)
    key_orientations, _ = jnp.linalg.qr(k_raw)

    softmax_index = jax.random.randint(k7, (M,), 0, NUM_GROUPS, dtype=jnp.int32)

    # max_tile_m=128 exercises multiple inner tiles (online merge) and the
    # 2-TensorCore split + wrapper merge at this small M.
    attn = gvp_attention(query_x, query_vector_x, query_orientations,
                         key_x, key_vector_x, key_orientations,
                         softmax_index, num_heads=H, num_groups=NUM_GROUPS,
                         max_tile_m=128)
    attn = jax.block_until_ready(attn)

    ref = _reference(query_x, query_vector_x, query_orientations,
                     key_x, key_vector_x, key_orientations,
                     softmax_index, H, NUM_GROUPS)

    assert attn.shape == (M, H)
    assert bool(jnp.all(jnp.isfinite(attn)))
    assert jnp.allclose(attn, ref, atol=1e-4, rtol=1e-4), (
        f"max abs err {jnp.abs(attn - ref).max()}")
    print("KERNEL_OK")
</pallas_src>

<mosaic_0001>
module attributes {stable_mosaic.version = 11 : i64} {
  func.func @_gvp_stats_kernel(%arg0: i32, %arg1: i32, %arg2: memref<64x128xf32, #tpu.memory_space<vmem>>, %arg3: memref<1x128xi32, #tpu.memory_space<vmem>>, %arg4: memref<2x12xf32, #tpu.memory_space<vmem>>, %arg5: memref<2x128xf32, #tpu.memory_space<vmem>>, %arg6: memref<1x2x5xf32, #tpu.memory_space<vmem>>, %arg7: memref<1x2x5xf32, #tpu.memory_space<vmem>>) attributes {dimension_semantics = [#tpu.dimension_semantics<parallel>, #tpu.dimension_semantics<arbitrary>], iteration_bounds = array<i64: 2, 2>, scalar_prefetch = 0 : i64, scratch_operands = 0 : i64, tpu.core_type = #tpu.core_type<tc>, window_params = [{transform_indices = @transform_0, window_bounds = array<i64: 64, 128>}, {transform_indices = @transform_1, window_bounds = array<i64: 1, 128>}, {pipeline_mode = #tpu.pipeline_mode<synchronous>, transform_indices = @transform_2, window_bounds = array<i64: 2, 12>}, {transform_indices = @transform_3, window_bounds = array<i64: 2, 128>}, {transform_indices = @transform_4, window_bounds = array<i64: 1, 2, 5>}, {transform_indices = @transform_5, window_bounds = array<i64: 1, 2, 5>}]} {
    %c0_i32 = arith.constant 0 : i32
    %0 = arith.cmpi eq, %arg1, %c0_i32 : i32
    %1 = arith.extui %0 : i1 to i32
    %c0_i32_0 = arith.constant 0 : i32
    %2 = arith.cmpi ne, %1, %c0_i32_0 : i32
    scf.if %2 {
      %cst_71 = arith.constant -1.000000e+30 : f32
      %131 = vector.broadcast %cst_71 : f32 to vector<2x5xf32>
      %c0_72 = arith.constant 0 : index
      %c0_73 = arith.constant 0 : index
      %c0_74 = arith.constant 0 : index
      %132 = vector.load %arg6[%c0_72, %c0_73, %c0_74] : memref<1x2x5xf32, #tpu.memory_space<vmem>>, vector<1x2x5xf32>
      %133 = vector.shape_cast %132 : vector<1x2x5xf32> to vector<2x5xf32>
      %134 = vector.shape_cast %131 : vector<2x5xf32> to vector<1x2x5xf32>
      tpu.vector_store %arg6[%c0_72, %c0_73, %c0_74], %134 {strides = array<i32>} : memref<1x2x5xf32, #tpu.memory_space<vmem>>, vector<1x2x5xf32>,
      %cst_75 = arith.constant 0.000000e+00 : f32
      %135 = vector.broadcast %cst_75 : f32 to vector<2x5xf32>
      %c0_76 = arith.constant 0 : index
      %c0_77 = arith.constant 0 : index
      %c0_78 = arith.constant 0 : index
      %136 = vector.load %arg7[%c0_76, %c0_77, %c0_78] : memref<1x2x5xf32, #tpu.memory_space<vmem>>, vector<1x2x5xf32>
      %137 = vector.shape_cast %136 : vector<1x2x5xf32> to vector<2x5xf32>
      %138 = vector.shape_cast %135 : vector<2x5xf32> to vector<1x2x5xf32>
      tpu.vector_store %arg7[%c0_76, %c0_77, %c0_78], %138 {strides = array<i32>} : memref<1x2x5xf32, #tpu.memory_space<vmem>>, vector<1x2x5xf32>,
    } else {
    }
    %c0 = arith.constant 0 : index
    %c0_1 = arith.constant 0 : index
    %3 = vector.load %arg4[%c0, %c0_1] : memref<2x12xf32, #tpu.memory_space<vmem>>, vector<2x12xf32>
    %c0_2 = arith.constant 0 : index
    %c0_3 = arith.constant 0 : index
    %4 = vector.load %arg2[%c0_2, %c0_3] : memref<64x128xf32, #tpu.memory_space<vmem>>, vector<8x128xf32>
    %c8 = arith.constant 8 : index
    %c0_4 = arith.constant 0 : index
    %5 = vector.load %arg2[%c8, %c0_4] : memref<64x128xf32, #tpu.memory_space<vmem>>, vector<8x128xf32>
    %6 = arith.mulf %4, %5 : vector<8x128xf32>
    %c16 = arith.constant 16 : index
    %c0_5 = arith.constant 0 : index
    %7 = vector.load %arg2[%c16, %c0_5] : memref<64x128xf32, #tpu.memory_space<vmem>>, vector<4x128xf32>
    %c28 = arith.constant 28 : index
    %c0_6 = arith.constant 0 : index
    %8 = vector.load %arg2[%c28, %c0_6] : memref<64x128xf32, #tpu.memory_space<vmem>>, vector<4x128xf32>
    %c40 = arith.constant 40 : index
    %c0_7 = arith.constant 0 : index
    %9 = vector.load %arg2[%c40, %c0_7] : memref<64x128xf32, #tpu.memory_space<vmem>>, vector<1x128xf32>
    %c49 = arith.constant 49 : index
    %c0_8 = arith.constant 0 : index
    %10 = vector.load %arg2[%c49, %c0_8] : memref<64x128xf32, #tpu.memory_space<vmem>>, vector<1x128xf32>
    %11 = vector.broadcast %9 : vector<1x128xf32> to vector<4x128xf32>
    %12 = arith.mulf %7, %11 : vector<4x128xf32>
    %13 = vector.broadcast %10 : vector<1x128xf32> to vector<4x128xf32>
    %14 = arith.mulf %8, %13 : vector<4x128xf32>
    %c20 = arith.constant 20 : index
    %c0_9 = arith.constant 0 : index
    %15 = vector.load %arg2[%c20, %c0_9] : memref<64x128xf32, #tpu.memory_space<vmem>>, vector<4x128xf32>
    %c32 = arith.constant 32 : index
    %c0_10 = arith.constant 0 : index
    %16 = vector.load %arg2[%c32, %c0_10] : memref<64x128xf32, #tpu.memory_space<vmem>>, vector<4x128xf32>
    %c43 = arith.constant 43 : index
    %c0_11 = arith.constant 0 : index
    %17 = vector.load %arg2[%c43, %c0_11] : memref<64x128xf32, #tpu.memory_space<vmem>>, vector<1x128xf32>
    %c52 = arith.constant 52 : index
    %c0_12 = arith.constant 0 : index
    %18 = vector.load %arg2[%c52, %c0_12] : memref<64x128xf32, #tpu.memory_space<vmem>>, vector<1x128xf32>
    %19 = vector.broadcast %17 : vector<1x128xf32> to vector<4x128xf32>
    %20 = arith.mulf %15, %19 : vector<4x128xf32>
    %21 = vector.broadcast %18 : vector<1x128xf32> to vector<4x128xf32>
    %22 = arith.mulf %16, %21 : vector<4x128xf32>
    %23 = arith.addf %12, %20 : vector<4x128xf32>
    %24 = arith.addf %14, %22 : vector<4x128xf32>
    %c24 = arith.constant 24 : index
    %c0_13 = arith.constant 0 : index
    %25 = vector.load %arg2[%c24, %c0_13] : memref<64x128xf32, #tpu.memory_space<vmem>>, vector<4x128xf32>
    %c36 = arith.constant 36 : index
    %c0_14 = arith.constant 0 : index
    %26 = vector.load %arg2[%c36, %c0_14] : memref<64x128xf32, #tpu.memory_space<vmem>>, vector<4x128xf32>
    %c46 = arith.constant 46 : index
    %c0_15 = arith.constant 0 : index
    %27 = vector.load %arg2[%c46, %c0_15] : memref<64x128xf32, #tpu.memory_space<vmem>>, vector<1x128xf32>
    %c55 = arith.constant 55 : index
    %c0_16 = arith.constant 0 : index
    %28 = vector.load %arg2[%c55, %c0_16] : memref<64x128xf32, #tpu.memory_space<vmem>>, vector<1x128xf32>
    %29 = vector.broadcast %27 : vector<1x128xf32> to vector<4x128xf32>
    %30 = arith.mulf %25, %29 : vector<4x128xf32>
    %31 = vector.broadcast %28 : vector<1x128xf32> to vector<4x128xf32>
    %32 = arith.mulf %26, %31 : vector<4x128xf32>
    %33 = arith.addf %23, %30 : vector<4x128xf32>
    %34 = arith.addf %24, %32 : vector<4x128xf32>
    %35 = arith.mulf %33, %34 : vector<4x128xf32>
    %c16_17 = arith.constant 16 : index
    %c0_18 = arith.constant 0 : index
    %36 = vector.load %arg2[%c16_17, %c0_18] : memref<64x128xf32, #tpu.memory_space<vmem>>, vector<4x128xf32>
    %c28_19 = arith.constant 28 : index
    %c0_20 = arith.constant 0 : index
    %37 = vector.load %arg2[%c28_19, %c0_20] : memref<64x128xf32, #tpu.memory_space<vmem>>, vector<4x128xf32>
    %c41 = arith.constant 41 : index
    %c0_21 = arith.constant 0 : index
    %38 = vector.load %arg2[%c41, %c0_21] : memref<64x128xf32, #tpu.memory_space<vmem>>, vector<1x128xf32>
    %c50 = arith.constant 50 : index
    %c0_22 = arith.constant 0 : index
    %39 = vector.load %arg2[%c50, %c0_22] : memref<64x128xf32, #tpu.memory_space<vmem>>, vector<1x128xf32>
    %40 = vector.broadcast %38 : vector<1x128xf32> to vector<4x128xf32>
    %41 = arith.mulf %36, %40 : vector<4x128xf32>
    %42 = vector.broadcast %39 : vector<1x128xf32> to vector<4x128xf32>
    %43 = arith.mulf %37, %42 : vector<4x128xf32>
    %c20_23 = arith.constant 20 : index
    %c0_24 = arith.constant 0 : index
    %44 = vector.load %arg2[%c20_23, %c0_24] : memref<64x128xf32, #tpu.memory_space<vmem>>, vector<4x128xf32>
    %c32_25 = arith.constant 32 : index
    %c0_26 = arith.constant 0 : index
    %45 = vector.load %arg2[%c32_25, %c0_26] : memref<64x128xf32, #tpu.memory_space<vmem>>, vector<4x128xf32>
    %c44 = arith.constant 44 : index
    %c0_27 = arith.constant 0 : index
    %46 = vector.load %arg2[%c44, %c0_27] : memref<64x128xf32, #tpu.memory_space<vmem>>, vector<1x128xf32>
    %c53 = arith.constant 53 : index
    %c0_28 = arith.constant 0 : index
    %47 = vector.load %arg2[%c53, %c0_28] : memref<64x128xf32, #tpu.memory_space<vmem>>, vector<1x128xf32>
    %48 = vector.broadcast %46 : vector<1x128xf32> to vector<4x128xf32>
    %49 = arith.mulf %44, %48 : vector<4x128xf32>
    %50 = vector.broadcast %47 : vector<1x128xf32> to vector<4x128xf32>
    %51 = arith.mulf %45, %50 : vector<4x128xf32>
    %52 = arith.addf %41, %49 : vector<4x128xf32>
    %53 = arith.addf %43, %51 : vector<4x128xf32>
    %c24_29 = arith.constant 24 : index
    %c0_30 = arith.constant 0 : index
    %54 = vector.load %arg2[%c24_29, %c0_30] : memref<64x128xf32, #tpu.memory_space<vmem>>, vector<4x128xf32>
    %c36_31 = arith.constant 36 : index
    %c0_32 = arith.constant 0 : index
    %55 = vector.load %arg2[%c36_31, %c0_32] : memref<64x128xf32, #tpu.memory_space<vmem>>, vector<4x128xf32>
    %c47 = arith.constant 47 : index
    %c0_33 = arith.constant 0 : index
    %56 = vector.load %arg2[%c47, %c0_33] : memref<64x128xf32, #tpu.memory_space<vmem>>, vector<1x128xf32>
    %c56 = arith.constant 56 : index
    %c0_34 = arith.constant 0 : index
    %57 = vector.load %arg2[%c56, %c0_34] : memref<64x128xf32, #tpu.memory_space<vmem>>, vector<1x128xf32>
    %58 = vector.broadcast %56 : vector<1x128xf32> to vector<4x128xf32>
    %59 = arith.mulf %54, %58 : vector<4x128xf32>
    %60 = vector.broadcast %57 : vector<1x128xf32> to vector<4x128xf32>
    %61 = arith.mulf %55, %60 : vector<4x128xf32>
    %62 = arith.addf %52, %59 : vector<4x128xf32>
    %63 = arith.addf %53, %61 : vector<4x128xf32>
    %64 = arith.mulf %62, %63 : vector<4x128xf32>
    %65 = arith.addf %35, %64 : vector<4x128xf32>
    %c16_35 = arith.constant 16 : index
    %c0_36 = arith.constant 0 : index
    %66 = vector.load %arg2[%c16_35, %c0_36] : memref<64x128xf32, #tpu.memory_space<vmem>>, vector<4x128xf32>
    %c28_37 = arith.constant 28 : index
    %c0_38 = arith.constant 0 : index
    %67 = vector.load %arg2[%c28_37, %c0_38] : memref<64x128xf32, #tpu.memory_space<vmem>>, vector<4x128xf32>
    %c42 = arith.constant 42 : index
    %c0_39 = arith.constant 0 : index
    %68 = vector.load %arg2[%c42, %c0_39] : memref<64x128xf32, #tpu.memory_space<vmem>>, vector<1x128xf32>
    %c51 = arith.constant 51 : index
    %c0_40 = arith.constant 0 : index
    %69 = vector.load %arg2[%c51, %c0_40] : memref<64x128xf32, #tpu.memory_space<vmem>>, vector<1x128xf32>
    %70 = vector.broadcast %68 : vector<1x128xf32> to vector<4x128xf32>
    %71 = arith.mulf %66, %70 : vector<4x128xf32>
    %72 = vector.broadcast %69 : vector<1x128xf32> to vector<4x128xf32>
    %73 = arith.mulf %67, %72 : vector<4x128xf32>
    %c20_41 = arith.constant 20 : index
    %c0_42 = arith.constant 0 : index
    %74 = vector.load %arg2[%c20_41, %c0_42] : memref<64x128xf32, #tpu.memory_space<vmem>>, vector<4x128xf32>
    %c32_43 = arith.constant 32 : index
    %c0_44 = arith.constant 0 : index
    %75 = vector.load %arg2[%c32_43, %c0_44] : memref<64x128xf32, #tpu.memory_space<vmem>>, vector<4x128xf32>
    %c45 = arith.constant 45 : index
    %c0_45 = arith.constant 0 : index
    %76 = vector.load %arg2[%c45, %c0_45] : memref<64x128xf32, #tpu.memory_space<vmem>>, vector<1x128xf32>
    %c54 = arith.constant 54 : index
    %c0_46 = arith.constant 0 : index
    %77 = vector.load %arg2[%c54, %c0_46] : memref<64x128xf32, #tpu.memory_space<vmem>>, vector<1x128xf32>
    %78 = vector.broadcast %76 : vector<1x128xf32> to vector<4x128xf32>
    %79 = arith.mulf %74, %78 : vector<4x128xf32>
    %80 = vector.broadcast %77 : vector<1x128xf32> to vector<4x128xf32>
    %81 = arith.mulf %75, %80 : vector<4x128xf32>
    %82 = arith.addf %71, %79 : vector<4x128xf32>
    %83 = arith.addf %73, %81 : vector<4x128xf32>
    %c24_47 = arith.constant 24 : index
    %c0_48 = arith.constant 0 : index
    %84 = vector.load %arg2[%c24_47, %c0_48] : memref<64x128xf32, #tpu.memory_space<vmem>>, vector<4x128xf32>
    %c36_49 = arith.constant 36 : index
    %c0_50 = arith.constant 0 : index
    %85 = vector.load %arg2[%c36_49, %c0_50] : memref<64x128xf32, #tpu.memory_space<vmem>>, vector<4x128xf32>
    %c48 = arith.constant 48 : index
    %c0_51 = arith.constant 0 : index
    %86 = vector.load %arg2[%c48, %c0_51] : memref<64x128xf32, #tpu.memory_space<vmem>>, vector<1x128xf32>
    %c57 = arith.constant 57 : index
    %c0_52 = arith.constant 0 : index
    %87 = vector.load %arg2[%c57, %c0_52] : memref<64x128xf32, #tpu.memory_space<vmem>>, vector<1x128xf32>
    %88 = vector.broadcast %86 : vector<1x128xf32> to vector<4x128xf32>
    %89 = arith.mulf %84, %88 : vector<4x128xf32>
    %90 = vector.broadcast %87 : vector<1x128xf32> to vector<4x128xf32>
    %91 = arith.mulf %85, %90 : vector<4x128xf32>
    %92 = arith.addf %82, %89 : vector<4x128xf32>
    %93 = arith.addf %83, %91 : vector<4x128xf32>
    %94 = arith.mulf %92, %93 : vector<4x128xf32>
    %95 = arith.addf %65, %94 : vector<4x128xf32>
    %96 = tpu.concatenate %6, %95 in 0 : vector<8x128xf32>, vector<4x128xf32> -> vector<12x128xf32>
    %cst = arith.constant dense<0.000000e+00> : vector<2x128xf32>
    %97 = tpu.matmul %3, %96, %cst {dimension_numbers = #tpu.dot_dimension_numbers<[1], [0], [0], [1], [0, 0, 1, 1], [], []>} : vector<2x12xf32>, vector<12x128xf32>, vector<2x128xf32> -> vector<2x128xf32>
    %c0_53 = arith.constant 0 : index
    %c0_54 = arith.constant 0 : index
    %98 = vector.load %arg5[%c0_53, %c0_54] : memref<2x128xf32, #tpu.memory_space<vmem>>, vector<2x128xf32>
    tpu.vector_store %arg5[%c0_53, %c0_54], %97 {strides = array<i32>} : memref<2x128xf32, #tpu.memory_space<vmem>>, vector<2x128xf32>,
    %c0_55 = arith.constant 0 : index
    %c0_56 = arith.constant 0 : index
    %99 = vector.load %arg3[%c0_55, %c0_56] : memref<1x128xi32, #tpu.memory_space<vmem>>, vector<1x128xi32>
    %100 = tpu.iota {dimensions = array<i32: 0>} : vector<5x128xi32>
    %101 = vector.broadcast %99 : vector<1x128xi32> to vector<5x128xi32>
    %102 = arith.cmpi eq, %100, %101 : vector<5x128xi32>
    %103 = arith.extui %102 : vector<5x128xi1> to vector<5x128xi32>
    %104 = arith.sitofp %103 : vector<5x128xi32> to vector<5x128xf32>
    %cst_57 = arith.constant dense<0xFF800000> : vector<2xf32>
    %105 = vector.multi_reduction <maximumf>, %97, %cst_57 [1] : vector<2x128xf32> to vector<2xf32>
    %106 = vector.shape_cast %105 : vector<2xf32> to vector<2x1xf32>
    %107 = vector.broadcast %106 : vector<2x1xf32> to vector<2x128xf32>
    %108 = arith.subf %97, %107 : vector<2x128xf32>
    %109 = math.exp %108 : vector<2x128xf32>
    %cst_58 = arith.constant dense<0.000000e+00> : vector<2x5xf32>
    %110 = tpu.matmul %109, %104, %cst_58 {dimension_numbers = #tpu.dot_dimension_numbers<[1], [1], [0], [0], [0, 0, 1, 0], [], []>} : vector<2x128xf32>, vector<5x128xf32>, vector<2x5xf32> -> vector<2x5xf32>
    %c0_59 = arith.constant 0 : index
    %c0_60 = arith.constant 0 : index
    %c0_61 = arith.constant 0 : index
    %111 = vector.load %arg6[%c0_59, %c0_60, %c0_61] : memref<1x2x5xf32, #tpu.memory_space<vmem>>, vector<1x2x5xf32>
    %112 = vector.shape_cast %111 : vector<1x2x5xf32> to vector<2x5xf32>
    %c0_62 = arith.constant 0 : index
    %c0_63 = arith.constant 0 : index
    %c0_64 = arith.constant 0 : index
    %113 = vector.load %arg7[%c0_62, %c0_63, %c0_64] : memref<1x2x5xf32, #tpu.memory_space<vmem>>, vector<1x2x5xf32>
    %114 = vector.shape_cast %113 : vector<1x2x5xf32> to vector<2x5xf32>
    %115 = vector.broadcast %106 : vector<2x1xf32> to vector<2x5xf32>
    %116 = arith.maximumf %112, %115 : vector<2x5xf32>
    %117 = arith.subf %112, %116 : vector<2x5xf32>
    %118 = math.exp %117 : vector<2x5xf32>
    %119 = arith.mulf %114, %118 : vector<2x5xf32>
    %120 = vector.broadcast %106 : vector<2x1xf32> to vector<2x5xf32>
    %121 = arith.subf %120, %116 : vector<2x5xf32>
    %122 = math.exp %121 : vector<2x5xf32>
    %123 = arith.mulf %110, %122 : vector<2x5xf32>
    %124 = arith.addf %119, %123 : vector<2x5xf32>
    %c0_65 = arith.constant 0 : index
    %c0_66 = arith.constant 0 : index
    %c0_67 = arith.constant 0 : index
    %125 = vector.load %arg7[%c0_65, %c0_66, %c0_67] : memref<1x2x5xf32, #tpu.memory_space<vmem>>, vector<1x2x5xf32>
    %126 = vector.shape_cast %125 : vector<1x2x5xf32> to vector<2x5xf32>
    %127 = vector.shape_cast %124 : vector<2x5xf32> to vector<1x2x5xf32>
    tpu.vector_store %arg7[%c0_65, %c0_66, %c0_67], %127 {strides = array<i32>} : memref<1x2x5xf32, #tpu.memory_space<vmem>>, vector<1x2x5xf32>,
    %c0_68 = arith.constant 0 : index
    %c0_69 = arith.constant 0 : index
    %c0_70 = arith.constant 0 : index
    %128 = vector.load %arg6[%c0_68, %c0_69, %c0_70] : memref<1x2x5xf32, #tpu.memory_space<vmem>>, vector<1x2x5xf32>
    %129 = vector.shape_cast %128 : vector<1x2x5xf32> to vector<2x5xf32>
    %130 = vector.shape_cast %116 : vector<2x5xf32> to vector<1x2x5xf32>
    tpu.vector_store %arg6[%c0_68, %c0_69, %c0_70], %130 {strides = array<i32>} : memref<1x2x5xf32, #tpu.memory_space<vmem>>, vector<1x2x5xf32>,
    return
  }
  func.func @transform_0(%arg0: i32, %arg1: i32) -> (i32, i32) {
    %c2_i32 = arith.constant 2 : i32
    %0 = arith.muli %arg0, %c2_i32 : i32
    %1 = arith.addi %0, %arg1 : i32
    %c0_i32 = arith.constant 0 : i32
    %c0_i32_0 = arith.constant 0 : i32
    return %c0_i32, %1 : i32, i32
  }
  func.func @transform_1(%arg0: i32, %arg1: i32) -> (i32, i32) {
    %c2_i32 = arith.constant 2 : i32
    %0 = arith.muli %arg0, %c2_i32 : i32
    %1 = arith.addi %0, %arg1 : i32
    %c0_i32 = arith.constant 0 : i32
    %c0_i32_0 = arith.constant 0 : i32
    return %c0_i32, %1 : i32, i32
  }
  func.func @transform_2(%arg0: i32, %arg1: i32) -> (i32, i32) {
    %c0_i32 = arith.constant 0 : i32
    %c0_i32_0 = arith.constant 0 : i32
    %c0_i32_1 = arith.constant 0 : i32
    return %c0_i32, %c0_i32_0 : i32, i32
  }
  func.func @transform_3(%arg0: i32, %arg1: i32) -> (i32, i32) {
    %c2_i32 = arith.constant 2 : i32
    %0 = arith.muli %arg0, %c2_i32 : i32
    %1 = arith.addi %0, %arg1 : i32
    %c0_i32 = arith.constant 0 : i32
    %c0_i32_0 = arith.constant 0 : i32
    return %c0_i32, %1 : i32, i32
  }
  func.func @transform_4(%arg0: i32, %arg1: i32) -> (i32, i32, i32) {
    %c0_i32 = arith.constant 0 : i32
    %c0_i32_0 = arith.constant 0 : i32
    %c0_i32_1 = arith.constant 0 : i32
    return %arg0, %c0_i32, %c0_i32_0 : i32, i32, i32
  }
  func.func @transform_5(%arg0: i32, %arg1: i32) -> (i32, i32, i32) {
    %c0_i32 = arith.constant 0 : i32
    %c0_i32_0 = arith.constant 0 : i32
    %c0_i32_1 = arith.constant 0 : i32
    return %arg0, %c0_i32, %c0_i32_0 : i32, i32, i32
  }
}

</mosaic_0001>

<bundles_post_ra>
// kernel: tpu_custom_call.1
= control target key start
LH: loop header
LB: loop body
LE: loop exit
PB: predicated region body
PF: predicated region fallthrough
CT: control target
= control target key end

     0   :  { %s1795_s0 = inlined_call_operand.hbm [shape: f32[64,512], index: 0, kind: input, shape index: {}]   ;;  %s1796_s1 = inlined_call_operand.hbm [shape: s32[1,512], index: 1, kind: input, shape index: {}]   ;;  %s1797_s2 = inlined_call_operand.vmem [shape: f32[2,12], index: 2, kind: input, shape index: {}]   ;;  %s1798_s3 = inlined_call_operand.hbm [shape: f32[2,512], index: 3, kind: output, shape index: {0}]   ;;  %s1799_s4 = inlined_call_operand.hbm [shape: f32[2,2,5], index: 4, kind: output, shape index: {1}]   ;;  %s1800_s5 = inlined_call_operand.hbm [shape: f32[2,2,5], index: 5, kind: output, shape index: {2}]  }
   0x1   :  { %1813 = sst [smem:[#allocation25_spill]] %s1795_s0 }
   0x2   :  { %11 = vsyncpa [#allocation3], 0 }
   0x3   :  { %13 = vsyncpa [#allocation3 + $0x1], 0 }
   0x4   :  { %14 = vsyncpa [#allocation6], 0 }
   0x5   :  { %16 = vsyncpa [#allocation6 + $0x1], 0 }
   0x6   :  { %17 = vsyncpa [#allocation4], 0 }
   0x7   :  { %19 = vsyncpa [#allocation4 + $0x1], 0 }
   0x8   :  { %20 = vsyncpa [#allocation9], 0 }
   0x9   :  { %22 = vsyncpa [#allocation9 + $0x1], 0  ;;  %s1371_s18 = smov 0   ;;  %s1373_s19 = smov 0  }
   0xa   :  { %s1375_s20 = smov 0   ;;  %s1377_s21 = smov 0  }
   0xb   :  { %s1379_s22 = smov 0   ;;  %s1381_s23 = smov 0  }
   0xc   :  { %s1383_s24 = smov 0   ;;  %s1385_s25 = smov 0  }
   0xd   :  { %s1387_s26 = smov 0   ;;  %s1389_s27 = smov 0  }
   0xe   :  { %s1391_s28 = smov 0  }
   0xf LB: > { %1814 = sst [smem:[#allocation15_spill]] %s1292_s20  ;;  %s1427_s29 = sadd.s32 4294967295, %s1324_s28   ;;  %s1324_s28 = sphi %s1391_s28, %s28_s28   ;;  %s1320_s27 = sphi %s1389_s27, %s1852_s27   ;;  %s1316_s26 = sphi %s1387_s26, %s1851_s26   ;;  %s1312_s25 = sphi %s1385_s25, %s1850_s25   ;;  %s1308_s24 = sphi %s1383_s24, %s1849_s24   ;;  %s1304_s23 = sphi %s1381_s23, %s1848_s23   ;;  %s1300_s22 = sphi %s1379_s22, %s1856_s22   ;;  %s1296_s21 = sphi %s1377_s21, %s1855_s21   ;;  %s1292_s20 = sphi %s1375_s20, %s1846_s20   ;;  %s1288_s19 = sphi %s1373_s19, %s1854_s19   ;;  %s1284_s18 = sphi %s1371_s18, %s1853_s18  }
  0x10   : > { %1815 = sst [smem:[#allocation16_spill]] %s1296_s21  ;;  %s1801_s30 = sadd.s32 4294967294, %s1324_s28  }
  0x11   : > { %1816 = sst [smem:[#allocation17_spill]] %s1304_s23  ;;  %s37_s6 = sadd.s32 1, %s1316_s26 }
  0x12   : > { %1817 = sst [smem:[#allocation18_spill]] %s1316_s26  ;;  %s40_s7 = sadd.s32 1, %s1320_s27 }
  0x13   : > { %1818 = sst [smem:[#allocation19_spill]] %s1320_s27  ;;  %p38_p0 = scmp.ge.s32.totalorder %s37_s6, 2 }
  0x14   : > { %s873_s8 = sshll.u32 %s1320_s27, 1  ;;  %s51_s10 = sadd.s32 1, %s1304_s23 }
  0x15   : > { %s1434_s9 = sadd.s32 %s1316_s26, %s873_s8  ;;  %s1858_s6 = smov (%p38_p0, %s37_s6), 0 }
  0x16   : > { %1819 = sst [smem:[#allocation20_spill]] %s1858_s6  ;;  %s1860_s7 = smov (!%p38_p0, %s40_s7), %s1320_s27 }
  0x17   : > { %p58_p1 = scmp.ne.s32.totalorder %s1304_s23, %s1300_s22  ;;  %p59_p2 = scmp.eq.s32.totalorder %s1324_s28, 0 }
  0x18   : > { %p42_p3 = scmp.ge.s32.totalorder %s1860_s7, 2  ;;  %p64_p4 = scmp.ne.s32.totalorder %s1300_s22, %s1296_s21 }
  0x19   : > { %p1445_p5 = por %p59_p2, %p58_p1  ;;  %p65_p6 = scmp.eq.s32.totalorder %s1427_s29, 0 }
  0x1a   : > { %s1862_s7 = smov (%p42_p3, %s1860_s7), 0  ;;  %p143_p8 = scmp.eq.s32.totalorder %s1427_s29, 3 }
  0x1b   : > { %1821 = sst [smem:[#allocation21_spill]] %s1862_s7  ;;  %p1452_p7 = por %p65_p6, %p64_p4 }
  0x1c   : > { %s874_s13 = sshll.u32 %s1862_s7, 1  ;;  %p1460_p9 = scmp.eq.s32.totalorder %s1801_s30, 3 }
  0x1d   : > { %s1822_s12 = scalar_select %p1452_p7, 1, 0 }
  0x1e   : > { %s47_s15 = sadd.s32 %s874_s13, %s1858_s6  ;;  %p1467_p10 = por %p143_p8, %p58_p1 }
  0x1f   : > { %s48_s17 = ssub.s32 %s1434_s9, %s47_s15  ;;  %p1474_p11 = por %p1460_p9, %p64_p4 }
  0x20   : > { %s1824_s16 = scalar_select %p1467_p10, 1, 0 }
  0x21   : > { %s1825_s8 = scalar_select %p1474_p11, 1, 0 }
  0x22   : > { %p49_p12 = scmp.eq.s32.totalorder %s48_s17, 0  ;;  %s155_s30 = ssub.s32 %s1320_s27, %s1862_s7 }
  0x23   : > { %p156_p13 = scmp.eq.s32.totalorder %s155_s30, 0  ;;  %s158_s26 = sadd.s32 1, %s1292_s20 }
  0x24   : > { %s1482_s21 = scalar_select %p49_p12, %s1304_s23, %s51_s10  }
  0x25   : > { %s1485_s13 = scalar_select %p156_p13, %s1292_s20, %s158_s26  }
  0x26   : > { %1826 = sst [smem:[#allocation22_spill]] %s1482_s21  ;;  %p168_p0 = scmp.ne.s32.totalorder %s1292_s20, %s1288_s19 }
  0x27   : > { %1827 = sst [smem:[#allocation23_spill]] %s1485_s13  ;;  %p174_p1 = scmp.ne.s32.totalorder %s1288_s19, %s1284_s18 }
  0x28   : > { %p972_p2 = scmp.lt.s32.totalorder %s1324_s28, 4  ;;  %p1494_p3 = por %p168_p0, %p143_p8 }
  0x29   : > { %p1500_p4 = por %p174_p1, %p1460_p9  ;;  %s1505_s30 = sand.u32 1, %s1304_s23  }
  0x2a   : > { %s1828_s15 = scalar_select %p1494_p3, 1, 0 }
  0x2b   : > { %s1829_s17 = scalar_select %p1500_p4, 1, 0 }
  0x2c   : > { %s883_s10 = sshll.u32 %s1434_s9, 7  ;;  %s881_s26 = sshll.u32 %s1505_s30, 6 }
  0x2d   : > { %1830 = sst [smem:[#allocation24_spill]] %s1829_s17  ;;  %s1831_s0 = sld [smem:[#allocation25_spill]] }
  0x2e   : > { %s228_s14 = scalar_lea.vmem [#allocation2], %s881_s26  ;;  %p1516_p6 = pnand %p972_p2, %p1445_p5 }
  0x2f   : > { %s236_s27 = sshll.u32 %s228_s14, 4  ;;  %s1520_s27 = int_to_ptr.vmem [resolvable:$true] %s236_s27 }
  0x30   : > { %p1080_p12 = pneg %p1516_p6 }
  0x33   : > { %s1512_s18 = scalar_lea.hbm %s1831_s0, %s883_s10  ;;  %s1083_s10 = scalar_lea.hbm %s1831_s0, 4096 }
  0x34   : > { %s1078_s6 = scalar_lea.hbm %s1512_s18, 1024  ;;  %p1084_p5 = scmp.lt.u32.totalorder %s1512_s18, %s1831_s0 }
  0x35   : > { %p1079_p9 = scmp.ne.s32.totalorder %s1512_s18, %s1078_s6  ;;  %p1085_p1 = scmp.lt.u32.totalorder %s1083_s10, %s1078_s6 }
  0x36   : > { %p1087_p8 = scmp.lt.u32.totalorder %s1078_s6, %s1512_s18 }
  0x37   : > { %p1081_p13 = pnand %p1080_p12, %p1079_p9  ;;  %p1086_p2 = por %p1085_p1, %p1084_p5 }
  0x39   : > { %p1082_p0 = pneg %p1081_p13  ;;  %p1088_p4 = por %p1087_p8, %p1086_p2 }
  0x3b   : > { %p1089_p11 = pnand %p1088_p4, %p1082_p0 }
  0x3d   : > { %1092 = shalt.err (!%p1089_p11)
}
  0x3e   : > { %s1093_s23 = scalar_lea.vmem %s1520_s27, 1024  ;;  %s1326_s7 = smov [#allocation2]  }
  0x3f   : > { %p1094_p9 = scmp.ne.s32.totalorder %s1520_s27, %s1093_s23  ;;  %s1098_s11 = sshll.u32 %s1326_s7, 4  ;;  %s1099_s11 = int_to_ptr.vmem [resolvable:$false] %s1098_s11 }
  0x40   : > { %s1100_s26 = scalar_lea.vmem %s1099_s11, 2048  ;;  %p1101_p3 = scmp.lt.s32.totalorder %s1520_s27, %s1099_s11 }
  0x41   : > { %p1096_p13 = pnand %p1094_p9, %p1080_p12  ;;  %p1102_p5 = scmp.lt.s32.totalorder %s1100_s26, %s1093_s23 }
  0x43   : > { %p1097_p10 = pneg %p1096_p13  ;;  %p1103_p1 = por %p1102_p5, %p1101_p3 }
  0x45   : > { %p1104_p8 = pnand %p1103_p1, %p1097_p10 }
  0x47   : > { %1107 = shalt.err (!%p1104_p8)
}
  0x48   : > { %s1327_s6 = smov 512   ;;  %s1328_s10 = smov 128  }
  0x49   : > { %s1329_s14 = smov 8   ;;  %s1833_s7 = scalar_lea.sflag [#allocation3], %s1505_s30 }
  0x4a   : > { %958 = dma.hbm_to_vmem [thread:$0]  (!%p1516_p6), %s1512_s18, 1024, %s1520_s27, %s1833_s7, %s1327_s6, %s1328_s10, %s1329_s14  }
  0x4b   : > { %p263_p11 = scmp.lt.s32.totalorder %s1324_s28, 5  ;;  %s885_s23 = sshll.u32 %s1434_s9, 4 }
  0x4c   : > { %p1834_p10 = scmp.ge.s32.totalorder %s1324_s28, 1  ;;  %s1562_s13 = scalar_lea.hbm %s1796_s1, %s885_s23 }
  0x4d   : > { %s249_s20 = scalar_lea.vmem [#allocation5], %s1505_s30  ;;  %s247_s27 = scalar_lea.sflag [#allocation6], %s1505_s30 }
  0x4e   : > { %p1555_p3 = pnand %p1834_p10, %p263_p11  ;;  %s258_s17 = sshll.u32 %s249_s20, 4  ;;  %s259_s17 = int_to_ptr.vmem [resolvable:$true] %s258_s17 }
  0x4f   : > { %s1108_s18 = scalar_lea.hbm %s1562_s13, 16  ;;  %s1113_s0 = scalar_lea.hbm %s1796_s1, 64 }
  0x50   : > { %s1835_s11 = scalar_select %p1555_p3, 1, 0 }
  0x51   : > { %p1109_p4 = scmp.ne.s32.totalorder %s1562_s13, %s1108_s18  ;;  %p1114_p9 = scmp.lt.u32.totalorder %s1562_s13, %s1796_s1 }
  0x52   : > { %p1115_p13 = scmp.lt.u32.totalorder %s1113_s0, %s1108_s18  ;;  %p1117_p1 = scmp.lt.u32.totalorder %s1108_s18, %s1562_s13 }
  0x53   : > { %p1111_p0 = pnand %p1109_p4, %p1080_p12 }
  0x54   : > { %p1116_p5 = por %p1115_p13, %p1114_p9 }
  0x55   : > { %p1112_p2 = pneg %p1111_p0 }
  0x56   : > { %p1118_p8 = por %p1117_p1, %p1116_p5 }
  0x58   : > { %p1119_p11 = pnand %p1118_p8, %p1112_p2 }
  0x5a   : > { %1122 = shalt.err (!%p1119_p11)
}
  0x5b   : > { %s1123_s20 = scalar_lea.vmem %s259_s17, 16  ;;  %s1330_s30 = smov [#allocation5]  }
  0x5c   : > { %p1124_p10 = scmp.ne.s32.totalorder %s259_s17, %s1123_s20  ;;  %s1128_s7 = sshll.u32 %s1330_s30, 4  ;;  %s1129_s7 = int_to_ptr.vmem [resolvable:$false] %s1128_s7 }
  0x5d   : > { %s1130_s23 = scalar_lea.vmem %s1129_s7, 32  ;;  %p1131_p7 = scmp.lt.s32.totalorder %s259_s17, %s1129_s7 }
  0x5e   : > { %p1126_p4 = pnand %p1124_p10, %p1080_p12  ;;  %p1132_p3 = scmp.lt.s32.totalorder %s1130_s23, %s1123_s20 }
  0x60   : > { %p1127_p0 = pneg %p1126_p4  ;;  %p1133_p9 = por %p1132_p3, %p1131_p7 }
  0x62   : > { %p1134_p13 = pnand %p1133_p9, %p1127_p0 }
  0x64   : > { %1137 = shalt.err (!%p1134_p13)
}
  0x65   : > { %961 = dma.hbm_to_vmem [thread:$0]  (!%p1516_p6), %s1562_s13, 16, %s259_s17, %s247_s27  }
  0x66   : > { %p1836_p2 = scmp.ne.s32.totalorder %s1835_s11, 0 }
  0x67   : > { %s1588_s26 = sand.u32 (!%p1836_p2), 1, %s1300_s22   ;;  %p1837_p7 = scmp.ne.s32.totalorder (!%p1836_p2), %s1822_s12, 0 }
  0x68   : > { %267 = sbr.rel (%p1836_p2) target bundleno = 750 (0x2ee), region = 32  ;;  %s887_s18 = sshll.u32 (!%p1836_p2), %s1588_s26, 6 }
  0x69   : > { %s270_s9 = scalar_lea.sflag (!%p1836_p2), [#allocation3], %s1588_s26  ;;  %s1592_s6 = scalar_lea.vmem (!%p1836_p2), [#allocation2], %s887_s18 }
  0x6f   : > { %1267 = dma.done.wait (%p1837_p7), %s270_s9, 1024  }
  0x70   : > { %1269 = vsyncadd (%p1837_p7), %s270_s9, 4294966272  ;;  %s279_s21 = scalar_lea.sflag [#allocation6], %s1588_s26  ;;  %s281_s13 = scalar_lea.vmem [#allocation5], %s1588_s26 }
  0x71   : > { %1271 = dma.done.wait (%p1837_p7), %s279_s21, 16  }
  0x72   : > { %1273 = vsyncadd (%p1837_p7), %s279_s21, 4294967280  ;;  %s888_s17 = sshll.u32 %s1588_s26, 1  ;;  %s312_s11 = sand.u32 1, %s1288_s19  }
  0x73   : > { %s889_s27 = sshll.u32 %s312_s11, 1  ;;  %s1606_s0 = scalar_lea.vmem [#allocation7], %s888_s17 }
  0x74   : > { %s1608_s10 = scalar_lea.vmem [#allocation8], %s889_s27  ;;  %s1610_s14 = scalar_lea.vmem [#allocation10], %s889_s27 }
  0x75   : > { %p891_p6 = scmp.ne.s32.totalorder %s1308_s24, 0 }
  0x76   : > { %vm332_vm0 = vcmask (!%p891_p6), 33792   ;;  %v1331_v0 = vmov (!%p891_p6), -1e+30   ;;  %v1332_v1 = vmov (!%p891_p6), 0.0  }
  0x77   : > { %331 = sbr.rel (%p891_p6) target bundleno = 126 (0x7e), region = 44  ;;  %333 = vst.msk [vmem:[%s1608_s10] sm:$0x3] (!%p891_p6), %vm332_vm0, %v1331_v0  ;;  %334 = vst.msk [vmem:[%s1610_s14] sm:$0x3] (!%p891_p6), %vm332_vm0, %v1332_v1 }
  0x7e PF: > { %v339_v2 = vld [vmem:[%s1592_s6 + $0x10] sm:$0xf]  ;;  %v1333_v3 = vmov 0.0|0.0   ;;  %v340_v4 = vld [vmem:[%s1592_s6 + $0x1c] sm:$0xf]  ;;  %v336_v56 = vld [vmem:[%s1592_s6] sm:$0xff] }
  0x7f   : > { %941 = vmatprep.subr.bf16.mxu0 %v1333_v3  ;;  %v892_v5 = vld [vmem:[%s1592_s6 + $0x28] ss:$0 sm:$0xff]  ;;  %v893_v6 = vld [vmem:[%s1592_s6 + $0x31] ss:$0 sm:$0xff]  ;;  %v353_v9 = vld [vmem:[%s1592_s6 + $0x14] sm:$0xf] }
  0x80   : > { %v347_v7 = vmul.f32 %v892_v5, %v339_v2  ;;  %v352_v8 = vmul.f32 %v893_v6, %v340_v4  ;;  %v354_v10 = vld [vmem:[%s1592_s6 + $0x20] sm:$0xf]  ;;  %v894_v11 = vld [vmem:[%s1592_s6 + $0x2b] ss:$0 sm:$0xff]  ;;  %v895_v12 = vld [vmem:[%s1592_s6 + $0x34] ss:$0 sm:$0xff] }
  0x81   : > { %v361_v13 = vmul.f32 %v894_v11, %v353_v9  ;;  %v369_v14 = vld [vmem:[%s1592_s6 + $0x18] sm:$0xf]  ;;  %v370_v15 = vld [vmem:[%s1592_s6 + $0x24] sm:$0xf]  ;;  %v366_v16 = vmul.f32 %v895_v12, %v354_v10  ;;  %v896_v17 = vld [vmem:[%s1592_s6 + $0x2e] ss:$0 sm:$0xff] }
  0x82   : > { %v897_v18 = vld [vmem:[%s1592_s6 + $0x37] ss:$0 sm:$0xff]  ;;  %v898_v19 = vld [vmem:[%s1592_s6 + $0x29] ss:$0 sm:$0xff]  ;;  %v377_v21 = vmul.f32 %v896_v17, %v369_v14  ;;  %v899_v23 = vld [vmem:[%s1592_s6 + $0x32] ss:$0 sm:$0xff] }
  0x83   : > { %v367_v20 = vadd.f32 %v361_v13, %v347_v7  ;;  %v382_v22 = vmul.f32 %v897_v18, %v370_v15  ;;  %v392_v24 = vmul.f32 %v898_v19, %v339_v2  ;;  %v900_v25 = vld [vmem:[%s1592_s6 + $0x2c] ss:$0 sm:$0xff]  ;;  %v901_v26 = vld [vmem:[%s1592_s6 + $0x35] ss:$0 sm:$0xff]  ;;  %v368_v27 = vadd.f32 %v366_v16, %v352_v8  ;;  %v902_v31 = vld [vmem:[%s1592_s6 + $0x2f] ss:$0 sm:$0xff] }
  0x84   : > { %v397_v28 = vmul.f32 %v899_v23, %v340_v4  ;;  %v404_v29 = vmul.f32 %v900_v25, %v353_v9  ;;  %v409_v30 = vmul.f32 %v901_v26, %v354_v10  ;;  %v903_v32 = vld [vmem:[%s1592_s6 + $0x38] ss:$0 sm:$0xff]  ;;  %v904_v33 = vld [vmem:[%s1592_s6 + $0x2a] ss:$0 sm:$0xff]  ;;  %v418_v35 = vmul.f32 %v902_v31, %v369_v14  ;;  %v905_v37 = vld [vmem:[%s1592_s6 + $0x33] ss:$0 sm:$0xff] }
  0x85   : > { %v383_v34 = vadd.f32 %v377_v21, %v367_v20  ;;  %v423_v36 = vmul.f32 %v903_v32, %v370_v15  ;;  %v434_v38 = vmul.f32 %v904_v33, %v339_v2  ;;  %v906_v39 = vld [vmem:[%s1592_s6 + $0x2d] ss:$0 sm:$0xff]  ;;  %v907_v40 = vld [vmem:[%s1592_s6 + $0x36] ss:$0 sm:$0xff]  ;;  %v384_v41 = vadd.f32 %v382_v22, %v368_v27  ;;  %v908_v45 = vld [vmem:[%s1592_s6 + $0x30] ss:$0 sm:$0xff] }
  0x86   : > { %v410_v42 = vadd.f32 %v404_v29, %v392_v24  ;;  %v411_v43 = vadd.f32 %v409_v30, %v397_v28  ;;  %v439_v44 = vmul.f32 %v905_v37, %v340_v4  ;;  %v909_v46 = vld [vmem:[%s1592_s6 + $0x39] ss:$0 sm:$0xff]  ;;  %v446_v47 = vmul.f32 %v906_v39, %v353_v9  ;;  %v337_v57 = vld [vmem:[%s1592_s6 + $0x8] sm:$0xff]  ;;  %v335_v3 = vld [vmem:[%s1797_s2] sm:$0x3]  ;;  %s656_s30 = sand.u32 1, %s1427_s29  }
  0x87   : > { %v451_v48 = vmul.f32 %v907_v40, %v354_v10  ;;  %v460_v49 = vmul.f32 %v908_v45, %v369_v14  ;;  %v465_v50 = vmul.f32 %v909_v46, %v370_v15  ;;  %v385_v51 = vmul.f32 %v384_v41, %v383_v34  ;;  %v912_v8 = vld [vmem:[%s281_s13] ss:$0 sm:$0xff]  ;;  %v1648_v11 = vld [vmem:[%s1608_s10] sm:$0x3]  ;;  %s920_s7 = sshll.u32 %s1312_s25, 5  ;;  %s690_s6 = sshll.u32 %s1608_s10, 4  ;;  %s691_s6 = int_to_ptr.vmem [resolvable:$true] %s690_s6 }
  0x88   : > { %v424_v52 = vadd.f32 %v418_v35, %v410_v42  ;;  %v425_v53 = vadd.f32 %v423_v36, %v411_v43  ;;  %v452_v54 = vadd.f32 %v446_v47, %v434_v38  ;;  %vm1334_vm1 = vmmov 0   ;;  %s1671_s9 = scalar_lea.hbm %s1799_s4, %s920_s7  ;;  %s1674_s21 = scalar_lea.sflag [#allocation9], %s656_s30 }
  0x89   : > { %v453_v55 = vadd.f32 %v451_v48, %v439_v44  ;;  %v1335_v59 = vmov 0.0   ;;  %v338_v63 = vmul.f32 %v337_v57, %v336_v56  ;;  %vm474_vm2 = vcmask 1043456   ;;  %s1138_s13 = scalar_lea.vmem %s691_s6, 32  ;;  %p1838_p3 = scmp.ne.s32.totalorder %s1828_s15, 0 }
  0x8a   : > { %v426_v58 = vmul.f32 %v425_v53, %v424_v52  ;;  %933 = vmatprep.mubr.msk.f32.mxu0 %vm1334_vm1, %v1335_v59  ;;  %936 = vmatprep.subr.mxu1 %v1335_v59  ;;  %v466_v60 = vadd.f32 %v460_v49, %v452_v54  ;;  %vm1336_vm3 = vmmov 1   ;;  %vm470_vm5 = vcmask 97280   ;;  %p1139_p12 = scmp.ne.s32.totalorder %s691_s6, %s1138_s13  ;;  %s1338_s17 = smov [#allocation8]  }
  0x8b   : > { %v467_v61 = vadd.f32 %v465_v50, %v453_v55  ;;  %938 = vmatprep.mubr.msk.f32.mxu1 %vm1334_vm1, %v1335_v59  ;;  %vm943_vm4 = vmpackc.low %vm474_vm2, %vm1336_vm3  ;;  %vm559_vm6 = vcmask 1041408   ;;  %v550_v7 = vlaneseq  ;;  %v1337_v10 = vmov 1.0   ;;  %s1142_s11 = sshll.u32 %s1338_s17, 4  ;;  %s1143_s11 = int_to_ptr.vmem [resolvable:$false] %s1142_s11 }
  0x8c   : > { %v427_v62 = vadd.f32 %v426_v58, %v385_v51  ;;  %vm648_vm8 = vcmask 33792   ;;  %p1140_p5 = pnand %p1139_p12, %p1838_p3  ;;  %s1144_s29 = scalar_lea.vmem %s1143_s11, 64 }
  0x8d   : > { %v468_v0 = vmul.f32 %v467_v61, %v466_v60  ;;  %v551_v9 = vshrl.u32 %v550_v7, 7  ;;  %p1145_p8 = scmp.lt.s32.totalorder %s691_s6, %s1143_s11  ;;  %p1146_p11 = scmp.lt.s32.totalorder %s1144_s29, %s1138_s13 }
  0x8e   : > { %p1141_p1 = pneg %p1140_p5 }
  0x8f   : > { %v469_v1 = vadd.f32 %v468_v0, %v427_v62  ;;  %vm556_vm7 = vcmp.eq.s32.totalorder %v551_v9, %v912_v8  ;;  %p1147_p10 = por %p1146_p11, %p1145_p8 }
  0x90   : > { %937 = vmatpush3.xpose.msk.msra.mxu1 %vm556_vm7, %v1337_v10 }
  0x91   : > { %v942_v2 = vpack.c.bf16 %v469_v1, %v338_v63  ;;  %p1148_p4 = pnand %p1147_p10, %p1141_p1 }
  0x93   : > { %944 = vmatpush3.bf16.msk.msra.mxu0 %vm943_vm4, %v942_v2 }
  0x96   : > { %934 = vmatmul.mubr.msk.f32.vlgmr.msra.gmra.mrb[0].mxu0 %vm470_vm5, %v335_v3 }
 0x169   : > { %v544_v4 = vpop.f32.mrb[0].mxu0 }
 0x16a   : > { %548 = vst [vmem:[%s1606_s0] sm:$0x3] %v544_v4  ;;  %v935_v5 = vpop.f32.mrb[1].mxu0  ;;  %v560_v6 = vsel %vm559_vm6, %v544_v4, -inf }
 0x16b   : > { %561 = vmax.xlane.f32.xlu0 %v560_v6 }
 0x1f8   : > { %v1650_v12 = vpop.xlane.xlu0 %561 }
 0x1f9   : > { %v563_v13 = vsub.f32 %v544_v4, %v1650_v12  ;;  %v1655_v14 = vmax.f32 %v1648_v11, %v1650_v12 }
 0x1fb   : > { %v564_v15 = vmul.f32 1.442695, %v563_v13  ;;  %v639_v16 = vsub.f32 %v1648_v11, %v1655_v14  ;;  %v643_v17 = vsub.f32 %v1650_v12, %v1655_v14  ;;  %650 = vst.msk [vmem:[%s1608_s10] sm:$0x3] %vm648_vm8, %v1655_v14 }
 0x1fd   : > { %1072 = vpow2.f32 %v564_v15 }
 0x207   : > { %v1073_v18 = vpop.eup %1072 }
 0x208   : > { %939 = vmatmul.mubr.f32.vlgmr.msra.gmra.mrb[0].mxu1 %v1073_v18 }
 0x209   : > { %1151 = shalt.err (!%p1148_p4)
}
 0x20a   : > { %s1152_s27 = scalar_lea.hbm %s1671_s9, 32  ;;  %s1156_s20 = scalar_lea.hbm %s1799_s4, 64 }
 0x20b   : > { %p1153_p0 = scmp.ne.s32.totalorder %s1671_s9, %s1152_s27  ;;  %p1157_p2 = scmp.lt.u32.totalorder %s1671_s9, %s1799_s4 }
 0x20c   : > { %p1158_p7 = scmp.lt.u32.totalorder %s1156_s20, %s1152_s27  ;;  %p1160_p12 = scmp.lt.u32.totalorder %s1152_s27, %s1671_s9 }
 0x20d   : > { %p1154_p9 = pnand %p1153_p0, %p1838_p3 }
 0x20e   : > { %p1159_p6 = por %p1158_p7, %p1157_p2 }
 0x20f   : > { %p1155_p13 = pneg %p1154_p9 }
 0x210   : > { %p1161_p5 = por %p1160_p12, %p1159_p6 }
 0x212   : > { %p1162_p1 = pnand %p1161_p5, %p1155_p13 }
 0x214   : > { %1165 = shalt.err (!%p1162_p1)
}
 0x215   : > { %950 = dma.vmem_to_hbm [thread:$0]  (%p1838_p3), %s691_s6, 32, %s1671_s9, %s1674_s21  }
 0x216   : > { %s918_s18 = sshll.u32 %s1312_s25, 1  ;;  %s677_s13 = sshll.u32 %s1606_s0, 4  ;;  %s1697_s13 = int_to_ptr.vmem [resolvable:$true] %s677_s13 }
 0x217   : > { %s670_s17 = sadd.s32 %s1308_s24, %s918_s18  ;;  %s652_s12 = scalar_lea.sflag [#allocation4], %s1588_s26 }
 0x218   : > { %s919_s11 = sshll.u32 %s670_s17, 5  ;;  %s1166_s20 = scalar_lea.vmem %s1697_s13, 32 }
 0x219   : > { %s675_s10 = scalar_lea.hbm %s1798_s3, %s919_s11  ;;  %p1167_p8 = scmp.ne.s32.totalorder %s1697_s13, %s1166_s20 }
 0x21a   : > { %p1839_p11 = scmp.ne.s32.totalorder %s1824_s16, 0  ;;  %s1339_s9 = smov [#allocation7]  }
 0x21b   : > { %s1170_s6 = sshll.u32 %s1339_s9, 4  ;;  %s1171_s6 = int_to_ptr.vmem [resolvable:$false] %s1170_s6 }
 0x21c   : > { %p1168_p10 = pnand %p1167_p8, %p1839_p11  ;;  %s1172_s24 = scalar_lea.vmem %s1171_s6, 64 }
 0x21d   : > { %p1173_p0 = scmp.lt.s32.totalorder %s1697_s13, %s1171_s6  ;;  %p1174_p9 = scmp.lt.s32.totalorder %s1172_s24, %s1166_s20 }
 0x21e   : > { %p1169_p4 = pneg %p1168_p10 }
 0x21f   : > { %p1175_p13 = por %p1174_p9, %p1173_p0 }
 0x221   : > { %p1176_p2 = pnand %p1175_p13, %p1169_p4 }
 0x223   : > { %1179 = shalt.err (!%p1176_p2)
}
 0x224   : > { %s1180_s0 = scalar_lea.hbm %s675_s10, 32  ;;  %s1184_s23 = scalar_lea.hbm %s1798_s3, 128 }
 0x225   : > { %p1181_p7 = scmp.ne.s32.totalorder %s675_s10, %s1180_s0  ;;  %p1185_p5 = scmp.lt.u32.totalorder %s675_s10, %s1798_s3 }
 0x226   : > { %p1186_p1 = scmp.lt.u32.totalorder %s1184_s23, %s1180_s0  ;;  %p1188_p10 = scmp.lt.u32.totalorder %s1180_s0, %s675_s10 }
 0x227   : > { %p1182_p6 = pnand %p1181_p7, %p1839_p11 }
 0x228   : > { %p1187_p8 = por %p1186_p1, %p1185_p5 }
 0x229   : > { %p1183_p12 = pneg %p1182_p6 }
 0x22a   : > { %p1189_p0 = por %p1188_p10, %p1187_p8 }
 0x22c   : > { %p1190_p4 = pnand %p1189_p0, %p1183_p12 }
 0x22e   : > { %1193 = shalt.err (!%p1190_p4)
}
 0x22f   : > { %949 = dma.vmem_to_hbm [thread:$0]  (%p1839_p11), %s1697_s13, 32, %s675_s10, %s652_s12   ;;  %v640_v19 = vmul.f32 1.442695, %v639_v16  ;;  %v644_v20 = vmul.f32 1.442695, %v643_v17 }
 0x230   : > { %v637_v22 = vld [vmem:[%s1610_s14] sm:$0x3]  ;;  %s703_s16 = sshll.u32 %s1610_s14, 4  ;;  %s1732_s29 = scalar_lea.hbm %s1800_s5, %s920_s7  ;;  %s704_s16 = int_to_ptr.vmem [resolvable:$true] %s703_s16 }
 0x231   : > { %1074 = vpow2.f32 %v640_v19  ;;  %s1194_s27 = scalar_lea.vmem %s704_s16, 32  ;;  %s1340_s10 = smov [#allocation10]  }
 0x232   : > { %1076 = vpow2.f32 %v644_v20  ;;  %p1195_p11 = scmp.ne.s32.totalorder %s704_s16, %s1194_s27  ;;  %s1198_s12 = sshll.u32 %s1340_s10, 4  ;;  %s1199_s12 = int_to_ptr.vmem [resolvable:$false] %s1198_s12 }
 0x233   : > { %s1200_s20 = scalar_lea.vmem %s1199_s12, 64  ;;  %p1201_p2 = scmp.lt.s32.totalorder %s704_s16, %s1199_s12 }
 0x234   : > { %p1196_p9 = pnand %p1195_p11, %p1838_p3  ;;  %p1202_p7 = scmp.lt.s32.totalorder %s1200_s20, %s1194_s27 }
 0x236   : > { %p1197_p13 = pneg %p1196_p9  ;;  %p1203_p6 = por %p1202_p7, %p1201_p2 }
 0x238   : > { %p1204_p12 = pnand %p1203_p6, %p1197_p13 }
 0x23b   : > { %v1075_v21 = vpop.eup %1074 }
 0x23c   : > { %v1077_v23 = vpop.eup %1076  ;;  %v642_v25 = vmul.f32 %v1075_v21, %v637_v22 }
 0x2db   : > { %v632_v24 = vpop.f32.mrb[0].mxu1 }
 0x2dc   : > { %v646_v26 = vmul.f32 %v1077_v23, %v632_v24  ;;  %v940_v27 = vpop.f32.mrb[1].mxu1 }
 0x2de   : > { %v647_v28 = vadd.f32 %v646_v26, %v642_v25 }
 0x2e0   : > { %649 = vst.msk [vmem:[%s1610_s14] sm:$0x3] %vm648_vm8, %v647_v28 }
 0x2e1   : > { %1207 = shalt.err (!%p1204_p12)
}
 0x2e2   : > { %s1208_s25 = scalar_lea.hbm %s1732_s29, 32  ;;  %s1212_s9 = scalar_lea.hbm %s1800_s5, 64 }
 0x2e3   : > { %p1209_p5 = scmp.ne.s32.totalorder %s1732_s29, %s1208_s25  ;;  %p1213_p10 = scmp.lt.u32.totalorder %s1732_s29, %s1800_s5 }
 0x2e4   : > { %p1214_p0 = scmp.lt.u32.totalorder %s1212_s9, %s1208_s25  ;;  %p1216_p11 = scmp.lt.u32.totalorder %s1208_s25, %s1732_s29 }
 0x2e5   : > { %p1210_p1 = pnand %p1209_p5, %p1838_p3 }
 0x2e6   : > { %p1215_p4 = por %p1214_p0, %p1213_p10 }
 0x2e7   : > { %p1211_p8 = pneg %p1210_p1 }
 0x2e8   : > { %p1217_p9 = por %p1216_p11, %p1215_p4 }
 0x2ea   : > { %p1218_p13 = pnand %p1217_p9, %p1211_p8 }
 0x2ec   : > { %1221 = shalt.err (!%p1218_p13)
}
 0x2ed   : > { %951 = dma.vmem_to_hbm [thread:$0]  (%p1838_p3), %s704_s16, 32, %s1732_s29, %s1674_s21  }
 0x2ee PF: > { %s1840_s0 = sld [smem:[#allocation16_spill]]  ;;  %p973_p2 = scmp.ge.s32.totalorder %s1324_s28, 2 }
 0x2ef   : > { %p1841_p7 = scmp.ne.s32.totalorder %s1825_s8, 0 }
 0x2f1   : > { %p963_p6 = pnand %p973_p2, %p1841_p7 }
 0x2f4   : > { %s715_s26 = sand.u32 1, %s1840_s0  }
 0x2f5   : > { %s716_s30 = scalar_lea.sflag [#allocation4], %s715_s26 }
 0x2f6   : > { %1275 = dma.done.wait (!%p963_p6), %s716_s30, 32  }
 0x2f7   : > { %1277 = vsyncadd (!%p963_p6), %s716_s30, 4294967264  ;;  %s1842_s23 = sadd.s32 4294967294, %s1324_s28   ;;  %s1843_s18 = sld [smem:[#allocation24_spill]] }
 0x2f8   : > { %s724_s17 = sand.u32 1, %s1842_s23  }
 0x2f9   : > { %s725_s15 = scalar_lea.sflag [#allocation9], %s724_s17 }
 0x2fd   : > { %p1844_p12 = scmp.ne.s32.totalorder %s1843_s18, 0 }
 0x2ff   : > { %p966_p5 = pnand %p973_p2, %p1844_p12 }
 0x301   : > { %1279 = dma.done.wait (!%p966_p5), %s725_s15, 64  }
 0x302   : > { %1281 = vsyncadd (!%p966_p5), %s725_s15, 4294967232  ;;  %s28_s28 = sadd.s32 1, %s1324_s28   ;;  %s1845_s21 = sld [smem:[#allocation15_spill]] }
 0x303   : > { %p25_p3 = scmp.ge.s32.totalorder %s28_s28, 6   ;;  %s1846_s20 = sld [smem:[#allocation23_spill]] }
 0x304   : > { %s1847_s8 = sld [smem:[#allocation17_spill]]  ;;  %s1848_s23 = sld [smem:[#allocation22_spill]] }
 0x305   : > { %s1849_s24 = sld [smem:[#allocation18_spill]]  ;;  %s1850_s25 = sld [smem:[#allocation19_spill]] }
 0x306   : > { %s1851_s26 = sld [smem:[#allocation20_spill]]  ;;  %s1852_s27 = sld [smem:[#allocation21_spill]] }
 0x307   : > { %s1853_s18 = smov %s1288_s19  ;;  %27 = sbr.rel (!%p25_p3) target bundleno = 15 (0xf), region = 126 }
 0x308   : > { %s1854_s19 = smov %s1845_s21  ;;  %s1855_s21 = smov %s1300_s22 }
 0x30a   : > { %s1856_s22 = smov %s1847_s8 }
 0x30e   :  { %739 = vsyncpa [#allocation3], 1 }
 0x30f   :  { %741 = vsyncpa [#allocation3 + $0x1], 1 }
 0x310   :  { %742 = vsyncpa [#allocation6], 1 }
 0x311   :  { %744 = vsyncpa [#allocation6 + $0x1], 1 }
 0x312   :  { %745 = vsyncpa [#allocation4], 1 }
 0x313   :  { %747 = vsyncpa [#allocation4 + $0x1], 1 }
 0x314   :  { %748 = vsyncpa [#allocation9], 1 }
 0x315   :  { %750 = vsyncpa [#allocation9 + $0x1], 1 }

</bundles_post_ra>
